<compile_context>
chip_gen: v5e
topology: v5e:2x2
jax: 0.10.0
libtpu: 0.0.40
codegen_flags: <defaults>
</compile_context>

<pallas_src>
import jax
import jax.numpy as jnp
from jax.experimental import pallas as pl
from jax.experimental.pallas import tpu as pltpu

SUBLANES = 8  # f32 sublane tile height


def rnn_fc_kernel(x_ref, w_ih_ref, w_hh_ref, b_h_ref, w_fc_ref, b_fc_ref, out_ref):
    """RNN recurrence + final FC, fully resident in VMEM.

    x_ref:    (T*Bp, E)  time-major flattened input, Bp = 8-padded batch
                         (row index = t*Bp + b; rows b >= B are zero)
    w_ih_ref: (E, H)
    w_hh_ref: (H, H)
    b_h_ref:  (1, H)     (= b_ih + b_hh)
    w_fc_ref: (H, O)
    b_fc_ref: (1, O)
    out_ref:  (Bp, O)    padded output; wrapper slices rows [:B]
    """
    TBp = x_ref.shape[0]
    Bp = out_ref.shape[0]          # == SUBLANES (padded batch rows)
    T = TBp // Bp

    w_ih = w_ih_ref[...]
    w_hh = w_hh_ref[...]
    b_h = b_h_ref[...]

    # --- Peeled first step with its own small projection: h_{-1} == 0, so
    #     h_0 = tanh(x_0 @ W_ih + b).  Issuing this separately lets the first
    #     recurrence step overlap the projection of the remaining timesteps.
    pre0 = jnp.dot(x_ref[0:Bp, :], w_ih, preferred_element_type=jnp.float32) + b_h
    h = jnp.tanh(pre0)  # (Bp, H)

    if T > 1:
        # --- Hoisted projection for timesteps 1..T-1: one MXU matmul, bias
        #     folded in here (single broadcast, outside the recurrence).
        pre_rest = (
            jnp.dot(x_ref[Bp:, :], w_ih, preferred_element_type=jnp.float32) + b_h
        )  # ((T-1)*Bp, H), time-major

        # --- Remaining T-1 steps. T is static, so this Python loop fully
        #     unrolls with static, 8-row tile-aligned slices; each step's
        #     critical path is just one small h @ W_hh (MXU) + add (VPU)
        #     + tanh (EUP).
        for t in range(1, T):
            h = jnp.tanh(
                pre_rest[(t - 1) * Bp:t * Bp, :]
                + jnp.dot(h, w_hh, preferred_element_type=jnp.float32)
            )

    # --- Final FC on the last hidden state; store the full padded slab
    #     (unmasked on the sublane axis), wrapper trims to B rows.
    out_ref[...] = (
        jnp.dot(h, w_fc_ref[...], preferred_element_type=jnp.float32) + b_fc_ref[...]
    )


def block_rnn_forward(x, w_ih, w_hh, b_h, w_fc, b_fc, pred_len, target_size):
    """x: [B, T, E] float32 (batch_first). Returns [B, pred_len, target_size]."""
    B, T, E = x.shape
    O = w_fc.shape[1]

    # Pad batch rows up to a full 8-sublane tile and flatten to a single
    # time-major 2-D slab so every in-kernel per-step slice is a tile-aligned
    # free view. (Tiny: T*Bp*E floats; fuses into the host->VMEM copy.)
    Bp = ((B + SUBLANES - 1) // SUBLANES) * SUBLANES
    x_tm = jnp.transpose(x, (1, 0, 2))                       # (T, B, E)
    if Bp != B:
        x_tm = jnp.pad(x_tm, ((0, 0), (0, Bp - B), (0, 0)))  # (T, Bp, E)
    x_tm = x_tm.reshape(T * Bp, E)

    out = pl.pallas_call(
        rnn_fc_kernel,
        out_shape=jax.ShapeDtypeStruct((Bp, O), jnp.float32),
        in_specs=[pl.BlockSpec(memory_space=pltpu.MemorySpace.VMEM)] * 6,
        out_specs=pl.BlockSpec(memory_space=pltpu.MemorySpace.VMEM),
    )(x_tm, w_ih, w_hh, b_h, w_fc, b_fc)

    return out[:B].reshape(B, pred_len, target_size)


if __name__ == "__main__":
    # Config (SMALL, consistent with the module): enc_in channels, pred_len horizon.
    enc_in = 4        # configs.enc_in  (target_size)
    pred_len = 8      # configs.pred_len (out_len)
    hidden_dim = 25
    batch = 2
    seq_len = 8       # input sequence length
    out_dim = pred_len * enc_in * 1  # out_len * target_size * nr_params

    key = jax.random.PRNGKey(0)
    keys = jax.random.split(key, 8)

    # Deterministic parameter init (uniform(-1/sqrt(H), 1/sqrt(H)), like PyTorch).
    bound = 1.0 / jnp.sqrt(jnp.float32(hidden_dim))
    w_ih = jax.random.uniform(keys[0], (enc_in, hidden_dim), jnp.float32, -bound, bound)
    w_hh = jax.random.uniform(keys[1], (hidden_dim, hidden_dim), jnp.float32, -bound, bound)
    b_ih = jax.random.uniform(keys[2], (1, hidden_dim), jnp.float32, -bound, bound)
    b_hh = jax.random.uniform(keys[3], (1, hidden_dim), jnp.float32, -bound, bound)
    b_h = b_ih + b_hh  # the two RNN biases always appear summed
    w_fc = jax.random.uniform(keys[4], (hidden_dim, out_dim), jnp.float32, -bound, bound)
    b_fc = jax.random.uniform(keys[5], (1, out_dim), jnp.float32, -bound, bound)

    # Inputs. x_mark / y_true / y_mark are unused by the forward pass.
    x_in = jax.random.normal(keys[6], (batch, seq_len, enc_in), jnp.float32)

    preds = block_rnn_forward(x_in, w_ih, w_hh, b_h, w_fc, b_fc, pred_len, enc_in)
    preds = jax.block_until_ready(preds)

    # Pure-JAX reference for sanity.
    def ref(x):
        h = jnp.zeros((batch, hidden_dim), jnp.float32)
        for t in range(seq_len):
            h = jnp.tanh(x[:, t, :] @ w_ih + h @ w_hh + b_h)
        return (h @ w_fc + b_fc).reshape(batch, pred_len, enc_in)

    assert preds.shape == (batch, pred_len, enc_in)
    assert jnp.allclose(preds, ref(x_in), atol=1e-5, rtol=1e-5)

    print("KERNEL_OK")
</pallas_src>

<mosaic_0001>
module attributes {stable_mosaic.version = 11 : i64} {
  func.func @rnn_fc_kernel(%arg0: memref<64x4xf32, #tpu.memory_space<vmem>>, %arg1: memref<4x25xf32, #tpu.memory_space<vmem>>, %arg2: memref<25x25xf32, #tpu.memory_space<vmem>>, %arg3: memref<1x25xf32, #tpu.memory_space<vmem>>, %arg4: memref<25x32xf32, #tpu.memory_space<vmem>>, %arg5: memref<1x32xf32, #tpu.memory_space<vmem>>, %arg6: memref<8x32xf32, #tpu.memory_space<vmem>>) attributes {dimension_semantics = [], scalar_prefetch = 0 : i64, scratch_operands = 0 : i64, tpu.core_type = #tpu.core_type<tc>} {
    %c0 = arith.constant 0 : index
    %c0_0 = arith.constant 0 : index
    %0 = vector.load %arg1[%c0, %c0_0] : memref<4x25xf32, #tpu.memory_space<vmem>>, vector<4x25xf32>
    %c0_1 = arith.constant 0 : index
    %c0_2 = arith.constant 0 : index
    %1 = vector.load %arg2[%c0_1, %c0_2] : memref<25x25xf32, #tpu.memory_space<vmem>>, vector<25x25xf32>
    %c0_3 = arith.constant 0 : index
    %c0_4 = arith.constant 0 : index
    %2 = vector.load %arg3[%c0_3, %c0_4] : memref<1x25xf32, #tpu.memory_space<vmem>>, vector<1x25xf32>
    %c0_5 = arith.constant 0 : index
    %c0_6 = arith.constant 0 : index
    %3 = vector.load %arg0[%c0_5, %c0_6] : memref<64x4xf32, #tpu.memory_space<vmem>>, vector<8x4xf32>
    %cst = arith.constant dense<0.000000e+00> : vector<8x25xf32>
    %4 = tpu.matmul %3, %0, %cst {dimension_numbers = #tpu.dot_dimension_numbers<[1], [0], [0], [1], [0, 0, 1, 1], [], []>} : vector<8x4xf32>, vector<4x25xf32>, vector<8x25xf32> -> vector<8x25xf32>
    %5 = vector.broadcast %2 : vector<1x25xf32> to vector<8x25xf32>
    %6 = arith.addf %4, %5 : vector<8x25xf32>
    %7 = math.tanh %6 : vector<8x25xf32>
    %c8 = arith.constant 8 : index
    %c0_7 = arith.constant 0 : index
    %8 = vector.load %arg0[%c8, %c0_7] : memref<64x4xf32, #tpu.memory_space<vmem>>, vector<56x4xf32>
    %cst_8 = arith.constant dense<0.000000e+00> : vector<56x25xf32>
    %9 = tpu.matmul %8, %0, %cst_8 {dimension_numbers = #tpu.dot_dimension_numbers<[1], [0], [0], [1], [0, 0, 1, 1], [], []>} : vector<56x4xf32>, vector<4x25xf32>, vector<56x25xf32> -> vector<56x25xf32>
    %10 = vector.broadcast %2 : vector<1x25xf32> to vector<56x25xf32>
    %11 = arith.addf %9, %10 : vector<56x25xf32>
    %12 = vector.extract_strided_slice %11 {offsets = [0, 0], sizes = [8, 25], strides = [1, 1]} : vector<56x25xf32> to vector<8x25xf32>
    %cst_9 = arith.constant dense<0.000000e+00> : vector<8x25xf32>
    %13 = tpu.matmul %7, %1, %cst_9 {dimension_numbers = #tpu.dot_dimension_numbers<[1], [0], [0], [1], [0, 0, 1, 1], [], []>} : vector<8x25xf32>, vector<25x25xf32>, vector<8x25xf32> -> vector<8x25xf32>
    %14 = arith.addf %12, %13 : vector<8x25xf32>
    %15 = math.tanh %14 : vector<8x25xf32>
    %16 = vector.extract_strided_slice %11 {offsets = [8, 0], sizes = [8, 25], strides = [1, 1]} : vector<56x25xf32> to vector<8x25xf32>
    %cst_10 = arith.constant dense<0.000000e+00> : vector<8x25xf32>
    %17 = tpu.matmul %15, %1, %cst_10 {dimension_numbers = #tpu.dot_dimension_numbers<[1], [0], [0], [1], [0, 0, 1, 1], [], []>} : vector<8x25xf32>, vector<25x25xf32>, vector<8x25xf32> -> vector<8x25xf32>
    %18 = arith.addf %16, %17 : vector<8x25xf32>
    %19 = math.tanh %18 : vector<8x25xf32>
    %20 = vector.extract_strided_slice %11 {offsets = [16, 0], sizes = [8, 25], strides = [1, 1]} : vector<56x25xf32> to vector<8x25xf32>
    %cst_11 = arith.constant dense<0.000000e+00> : vector<8x25xf32>
    %21 = tpu.matmul %19, %1, %cst_11 {dimension_numbers = #tpu.dot_dimension_numbers<[1], [0], [0], [1], [0, 0, 1, 1], [], []>} : vector<8x25xf32>, vector<25x25xf32>, vector<8x25xf32> -> vector<8x25xf32>
    %22 = arith.addf %20, %21 : vector<8x25xf32>
    %23 = math.tanh %22 : vector<8x25xf32>
    %24 = vector.extract_strided_slice %11 {offsets = [24, 0], sizes = [8, 25], strides = [1, 1]} : vector<56x25xf32> to vector<8x25xf32>
    %cst_12 = arith.constant dense<0.000000e+00> : vector<8x25xf32>
    %25 = tpu.matmul %23, %1, %cst_12 {dimension_numbers = #tpu.dot_dimension_numbers<[1], [0], [0], [1], [0, 0, 1, 1], [], []>} : vector<8x25xf32>, vector<25x25xf32>, vector<8x25xf32> -> vector<8x25xf32>
    %26 = arith.addf %24, %25 : vector<8x25xf32>
    %27 = math.tanh %26 : vector<8x25xf32>
    %28 = vector.extract_strided_slice %11 {offsets = [32, 0], sizes = [8, 25], strides = [1, 1]} : vector<56x25xf32> to vector<8x25xf32>
    %cst_13 = arith.constant dense<0.000000e+00> : vector<8x25xf32>
    %29 = tpu.matmul %27, %1, %cst_13 {dimension_numbers = #tpu.dot_dimension_numbers<[1], [0], [0], [1], [0, 0, 1, 1], [], []>} : vector<8x25xf32>, vector<25x25xf32>, vector<8x25xf32> -> vector<8x25xf32>
    %30 = arith.addf %28, %29 : vector<8x25xf32>
    %31 = math.tanh %30 : vector<8x25xf32>
    %32 = vector.extract_strided_slice %11 {offsets = [40, 0], sizes = [8, 25], strides = [1, 1]} : vector<56x25xf32> to vector<8x25xf32>
    %cst_14 = arith.constant dense<0.000000e+00> : vector<8x25xf32>
    %33 = tpu.matmul %31, %1, %cst_14 {dimension_numbers = #tpu.dot_dimension_numbers<[1], [0], [0], [1], [0, 0, 1, 1], [], []>} : vector<8x25xf32>, vector<25x25xf32>, vector<8x25xf32> -> vector<8x25xf32>
    %34 = arith.addf %32, %33 : vector<8x25xf32>
    %35 = math.tanh %34 : vector<8x25xf32>
    %36 = vector.extract_strided_slice %11 {offsets = [48, 0], sizes = [8, 25], strides = [1, 1]} : vector<56x25xf32> to vector<8x25xf32>
    %cst_15 = arith.constant dense<0.000000e+00> : vector<8x25xf32>
    %37 = tpu.matmul %35, %1, %cst_15 {dimension_numbers = #tpu.dot_dimension_numbers<[1], [0], [0], [1], [0, 0, 1, 1], [], []>} : vector<8x25xf32>, vector<25x25xf32>, vector<8x25xf32> -> vector<8x25xf32>
    %38 = arith.addf %36, %37 : vector<8x25xf32>
    %39 = math.tanh %38 : vector<8x25xf32>
    %c0_16 = arith.constant 0 : index
    %c0_17 = arith.constant 0 : index
    %40 = vector.load %arg4[%c0_16, %c0_17] : memref<25x32xf32, #tpu.memory_space<vmem>>, vector<25x32xf32>
    %cst_18 = arith.constant dense<0.000000e+00> : vector<8x32xf32>
    %41 = tpu.matmul %39, %40, %cst_18 {dimension_numbers = #tpu.dot_dimension_numbers<[1], [0], [0], [1], [0, 0, 1, 1], [], []>} : vector<8x25xf32>, vector<25x32xf32>, vector<8x32xf32> -> vector<8x32xf32>
    %c0_19 = arith.constant 0 : index
    %c0_20 = arith.constant 0 : index
    %42 = vector.load %arg5[%c0_19, %c0_20] : memref<1x32xf32, #tpu.memory_space<vmem>>, vector<1x32xf32>
    %43 = vector.broadcast %42 : vector<1x32xf32> to vector<8x32xf32>
    %44 = arith.addf %41, %43 : vector<8x32xf32>
    %c0_21 = arith.constant 0 : index
    %c0_22 = arith.constant 0 : index
    %45 = vector.load %arg6[%c0_21, %c0_22] : memref<8x32xf32, #tpu.memory_space<vmem>>, vector<8x32xf32>
    tpu.vector_store %arg6[%c0_21, %c0_22], %44 {strides = array<i32>} : memref<8x32xf32, #tpu.memory_space<vmem>>, vector<8x32xf32>,
    return
  }
}

</mosaic_0001>

<bundles_post_ra>
// kernel: tpu_custom_call.1
= control target key start
LH: loop header
LB: loop body
LE: loop exit
PB: predicated region body
PF: predicated region fallthrough
CT: control target
= control target key end

     0   :  { %vm38_vm0 = vcmask 1043456   ;;  %vm34_vm1 = vcmask 31744   ;;  %s564_s0 = inlined_call_operand.vmem [shape: f32[64,4], index: 0, kind: input, shape index: {}]   ;;  %s565_s1 = inlined_call_operand.vmem [shape: f32[4,25], index: 1, kind: input, shape index: {}]   ;;  %s566_s2 = inlined_call_operand.vmem [shape: f32[25,25], index: 2, kind: input, shape index: {}]   ;;  %s567_s3 = inlined_call_operand.vmem [shape: f32[1,25], index: 3, kind: input, shape index: {}]   ;;  %s568_s4 = inlined_call_operand.vmem [shape: f32[25,32], index: 4, kind: input, shape index: {}]   ;;  %s569_s5 = inlined_call_operand.vmem [shape: f32[1,32], index: 5, kind: input, shape index: {}]   ;;  %s570_s6 = inlined_call_operand.hbm [shape: f32[8,32], index: 6, kind: output, shape index: {}]  }
   0x1   :  { %v24_v0 = vld [vmem:[%s565_s1] sm:$0xf] }
   0x2   :  { %v30_v1 = vld [vmem:[%s564_s0] sm:$0xff]  ;;  %361 = vmatpush.msk.msra.mxu2 %vm38_vm0, %v24_v0  ;;  %363 = vmatpush.msk.msra.mxu0 %vm38_vm0, %v24_v0 }
   0x3   :  { %362 = vmatmul.msk.f32.vlgmr.msra.gmra.mxu2 %vm34_vm1, %v30_v1  ;;  %388 = vmatpush.msk.msra.mxu3 %vm38_vm0, %v24_v0 }
   0x4   :  { %11 = vsyncpa [#allocation3], 0  ;;  %387 = vmatpush.msk.msra.mxu1 %vm38_vm0, %v24_v0  ;;  %v28_v2 = vld [vmem:[%s566_s2 + $0x18] sm:$0x1]  ;;  %vm133_vm2 = vcmask 1040384   ;;  %v27_v3 = vld [vmem:[%s566_s2 + $0x10] sm:$0xff] }
   0x5   :  { %371 = vmatpush.msk.msrb.mxu2 %vm133_vm2, %v28_v2  ;;  %373 = vmatpush.msk.msrb.mxu3 %vm133_vm2, %v28_v2  ;;  %v26_v4 = vld [vmem:[%s566_s2 + $0x8] sm:$0xff]  ;;  %v25_v5 = vld [vmem:[%s566_s2] sm:$0xff]  ;;  %vm129_vm3 = vcmask 203776   ;;  %v69_v11 = vld [vmem:[%s564_s0 + $0x38] sm:$0xff]  ;;  %s434_s30 = smov [#allocation2]   ;;  %vm343_vm4 = vcmask 261120  }
   0x6   :  { %375 = vmatpush.msk.msrb.mxu0 %vm133_vm2, %v28_v2  ;;  %v63_v6 = vld [vmem:[%s564_s0 + $0x8] sm:$0xff]  ;;  %v501_v7 = vld [vmem:[%s567_s3] ss:$0 sm:$0xff]  ;;  %370 = vmatmul.msk.f32.vlgmr.msra.gmra.mxu3 %vm34_vm1, %v69_v11  ;;  %v64_v12 = vld [vmem:[%s564_s0 + $0x10] sm:$0xff]  ;;  %s350_s7 = sshll.u32 %s434_s30, 4  ;;  %s351_s7 = int_to_ptr.vmem [resolvable:$true] %s350_s7 }
   0x7   :  { %150 = vmatpush.msrb.mxu2 %v27_v3  ;;  %175 = vmatpush.msrb.mxu3 %v27_v3  ;;  %v65_v18 = vld [vmem:[%s564_s0 + $0x18] sm:$0xff]  ;;  %v66_v25 = vld [vmem:[%s564_s0 + $0x20] sm:$0xff]  ;;  %v67_v31 = vld [vmem:[%s564_s0 + $0x28] sm:$0xff] }
   0x8   :  { %200 = vmatpush.msrb.mxu0 %v27_v3  ;;  %366 = vmatmul.msk.f32.vlgmr.msra.gmra.mxu1 %vm34_vm1, %v65_v18  ;;  %v68_v37 = vld [vmem:[%s564_s0 + $0x30] sm:$0xff]  ;;  %v312_v48 = vld [vmem:[%s568_s4 + $0x18] sm:$0x1]  ;;  %v310_v50 = vld [vmem:[%s568_s4 + $0x8] sm:$0xff] }
   0x9   :  { %151 = vmatpush.msrb.mxu2 %v26_v4  ;;  %176 = vmatpush.msrb.mxu3 %v26_v4  ;;  %v311_v49 = vld [vmem:[%s568_s4 + $0x10] sm:$0xff]  ;;  %v309_v51 = vld [vmem:[%s568_s4] sm:$0xff]  ;;  %s352_s4 = sshll.u32 %s570_s6, 4  ;;  %s353_s4 = int_to_ptr.hbm [resolvable:$true] %s352_s4 }
   0xa   :  { %201 = vmatpush.msrb.mxu0 %v26_v4  ;;  %v391_v56 = vld [vmem:[%s569_s5] ss:$0 sm:$0xff] }
   0xb   :  { %152 = vmatpush.msrb.mxu2 %v25_v5  ;;  %177 = vmatpush.msrb.mxu3 %v25_v5 }
   0xc   :  { %202 = vmatpush.msrb.mxu0 %v25_v5 }
   0xd   :  { %377 = vmatpush.msk.msra.mxu2 %vm133_vm2, %v28_v2  ;;  %364 = vmatmul.msk.f32.vlgmr.msra.gmra.mxu0 %vm34_vm1, %v63_v6 }
   0xe   :  { %381 = vmatpush.msk.msra.mxu0 %vm133_vm2, %v28_v2  ;;  %379 = vmatpush.msk.msra.mxu3 %vm133_vm2, %v28_v2 }
   0xf   :  { %225 = vmatpush.msra.mxu2 %v27_v3 }
  0x10   :  { %275 = vmatpush.msra.mxu0 %v27_v3  ;;  %250 = vmatpush.msra.mxu3 %v27_v3 }
  0x11   :  { %226 = vmatpush.msra.mxu2 %v26_v4  ;;  %367 = vmatmul.msk.f32.gmra.mxu1 %vm34_vm1, %v66_v25 }
  0x12   :  { %276 = vmatpush.msra.mxu0 %v26_v4  ;;  %251 = vmatpush.msra.mxu3 %v26_v4 }
  0x13   :  { %227 = vmatpush.msra.mxu2 %v25_v5 }
  0x14   :  { %277 = vmatpush.msra.mxu0 %v25_v5  ;;  %252 = vmatpush.msra.mxu3 %v25_v5 }
  0x15   :  { %365 = vmatmul.msk.f32.gmra.mxu0 %vm34_vm1, %v64_v12 }
  0x19   :  { %368 = vmatmul.msk.f32.gmra.mxu1 %vm34_vm1, %v67_v31 }
  0x21   :  { %369 = vmatmul.msk.f32.gmra.mxu1 %vm34_vm1, %v68_v37 }
  0x85   :  { %v114_v26 = vpop.f32.mrf.mxu1 }
  0x86   :  { %v59_v8 = vpop.f32.mrf.mxu2  ;;  %v115_v27 = vadd.f32 %v501_v7, %v114_v26 }
  0x87   :  { %v60_v9 = vadd.f32 %v501_v7, %v59_v8 }
  0x89   :  { %392 = vtanh.f32 %v60_v9  ;;  %v126_v19 = vpop.f32.mrf.mxu3 }
  0x8a   :  { %v108_v13 = vpop.f32.mrf.mxu0  ;;  %v127_v52 = vadd.f32 %v501_v7, %v126_v19 }
  0x8b   :  { %v109_v14 = vadd.f32 %v501_v7, %v108_v13 }
  0x8e   :  { %v117_v32 = vpop.f32.mrf.mxu1 }
  0x8f   :  { %v393_v10 = vpop.eup %392  ;;  %v118_v33 = vadd.f32 %v501_v7, %v117_v32 }
  0x90   :  { %372 = vmatmul.msk.f32.vlgmr.msrb.gmra.mxu2 %vm129_vm3, %v393_v10 }
  0x91   :  { %383 = vmatpush.msk.msrb.mxu2 %vm133_vm2, %v28_v2 }
  0x92   :  { %v111_v20 = vpop.f32.mrf.mxu0 }
  0x93   :  { %300 = vmatpush.msrb.mxu2 %v27_v3  ;;  %v112_v21 = vadd.f32 %v501_v7, %v111_v20 }
  0x95   :  { %301 = vmatpush.msrb.mxu2 %v26_v4 }
  0x96   :  { %v120_v38 = vpop.f32.mrf.mxu1 }
  0x97   :  { %302 = vmatpush.msrb.mxu2 %v25_v5  ;;  %v121_v39 = vadd.f32 %v501_v7, %v120_v38 }
  0x9e   :  { %v123_v43 = vpop.f32.mrf.mxu1 }
  0x9f   :  { %v124_v44 = vadd.f32 %v501_v7, %v123_v43 }
 0x113   :  { %v154_v15 = vpop.f32.mrf.mxu2 }
 0x114   :  { %v157_v16 = vadd.f32 %v154_v15, %v109_v14 }
 0x116   :  { %394 = vtanh.f32 %v157_v16 }
 0x11c   :  { %v395_v17 = vpop.eup %394 }
 0x11d   :  { %374 = vmatmul.msk.f32.vlgmr.msrb.gmra.mxu3 %vm129_vm3, %v395_v17 }
 0x11e   :  { %385 = vmatpush.msk.msrb.mxu3 %vm133_vm2, %v312_v48 }
 0x120   :  { %336 = vmatpush.msrb.mxu3 %v311_v49 }
 0x122   :  { %337 = vmatpush.msrb.mxu3 %v310_v50 }
 0x124   :  { %338 = vmatpush.msrb.mxu3 %v309_v51 }
 0x1a0   :  { %v179_v22 = vpop.f32.mrf.mxu3 }
 0x1a1   :  { %v182_v23 = vadd.f32 %v179_v22, %v112_v21 }
 0x1a3   :  { %396 = vtanh.f32 %v182_v23 }
 0x1a9   :  { %v397_v24 = vpop.eup %396 }
 0x1aa   :  { %376 = vmatmul.msk.f32.vlgmr.msrb.gmra.mxu0 %vm129_vm3, %v397_v24 }
 0x227   :  { %v204_v28 = vpop.f32.mrf.mxu0 }
 0x228   :  { %v207_v29 = vadd.f32 %v204_v28, %v115_v27 }
 0x22a   :  { %398 = vtanh.f32 %v207_v29 }
 0x230   :  { %v399_v30 = vpop.eup %398 }
 0x231   :  { %378 = vmatmul.msk.f32.vlgmr.msra.gmra.mxu2 %vm129_vm3, %v399_v30 }
 0x2b4   :  { %v229_v34 = vpop.f32.mrf.mxu2 }
 0x2b5   :  { %v232_v35 = vadd.f32 %v229_v34, %v118_v33 }
 0x2b7   :  { %400 = vtanh.f32 %v232_v35 }
 0x2bd   :  { %v401_v36 = vpop.eup %400 }
 0x2be   :  { %380 = vmatmul.msk.f32.vlgmr.msra.gmra.mxu3 %vm129_vm3, %v401_v36 }
 0x341   :  { %v254_v40 = vpop.f32.mrf.mxu3 }
 0x342   :  { %v257_v41 = vadd.f32 %v254_v40, %v121_v39 }
 0x344   :  { %402 = vtanh.f32 %v257_v41 }
 0x34a   :  { %v403_v42 = vpop.eup %402 }
 0x34b   :  { %382 = vmatmul.msk.f32.vlgmr.msra.gmra.mxu0 %vm129_vm3, %v403_v42 }
 0x3c8   :  { %v279_v45 = vpop.f32.mrf.mxu0 }
 0x3c9   :  { %v282_v46 = vadd.f32 %v279_v45, %v124_v44 }
 0x3cb   :  { %404 = vtanh.f32 %v282_v46 }
 0x3d1   :  { %v405_v47 = vpop.eup %404 }
 0x3d2   :  { %384 = vmatmul.msk.f32.vlgmr.msrb.gmra.mxu2 %vm129_vm3, %v405_v47 }
 0x455   :  { %v304_v53 = vpop.f32.mrf.mxu2 }
 0x456   :  { %v307_v54 = vadd.f32 %v304_v53, %v127_v52 }
 0x458   :  { %406 = vtanh.f32 %v307_v54 }
 0x45e   :  { %v407_v55 = vpop.eup %406 }
 0x45f   :  { %386 = vmatmul.msk.f32.vlgmr.msrb.gmra.mxu3 %vm129_vm3, %v407_v55 }
 0x4e2   :  { %v340_v57 = vpop.f32.mrf.mxu3 }
 0x4e3   :  { %v341_v58 = vadd.f32 %v391_v56, %v340_v57 }
 0x4e5   :  { %344 = vst.msk [vmem:[#allocation2] sm:$0xff] %vm343_vm4, %v341_v58 }
 0x4e6   :  { %355 = dma.vmem_to_hbm [thread:$0]  %s351_s7, 128, %s353_s4, [#allocation3]  }
 0x4e7   :  { %432 = dma.done.wait [#allocation3], 128  }
 0x4e8   :  { %433 = vsyncadd [#allocation3], 4294967168 }
 0x4e9   :  { %360 = vsyncpa [#allocation3], 1 }

</bundles_post_ra>
